<compile_context>
chip_gen: v7x
topology: tpu7x:2x2x1
jax: 0.10.0
libtpu: 0.0.40
codegen_flags: <defaults>
</compile_context>

<pallas_src>
import functools

import jax
import jax.numpy as jnp
from jax.experimental import pallas as pl
from jax.experimental.pallas import tpu as pltpu

_LANE = 128
_SUBLANE = 8


def _round_up(n, m):
    return ((n + m - 1) // m) * m


def _leaky_relu(v, slope=0.2):
    return jnp.where(v > 0, v, slope * v)


def _icnn_kernel(n_hidden, hp, offs, *refs):
    """refs = (x_aug, A_cat, W_pad[0..n_hidden-2], w_last_row, y_out)."""
    x_ref = refs[0]
    a_cat_ref = refs[1]
    w_refs = refs[2:2 + n_hidden - 1]
    w_last_ref = refs[2 + n_hidden - 1]
    out_ref = refs[-1]

    mm_dtype = a_cat_ref.dtype

    # One fused, lane-dense MXU pass for every A-branch linear; biases ride in
    # via the ones column of x_aug / bias row of A_cat.
    ax = jnp.dot(x_ref[...], a_cat_ref[...], preferred_element_type=jnp.float32)

    # z = sigma(0.2)(A[0](x)); z = z * z     (elementwise kept in f32: v5e-safe)
    z = _leaky_relu(ax[:, offs[0]:offs[0] + hp[0]])
    z = z * z

    # hidden ICNN layers: z = sigma(0.2)(W[i](z) + A[i+1](x))
    for i in range(n_hidden - 1):
        o = offs[i + 1]
        zi = jnp.dot(z.astype(mm_dtype), w_refs[i][...],
                     preferred_element_type=jnp.float32)
        z = _leaky_relu(zi + ax[:, o:o + hp[i + 1]])

    # final layer: y = W[-1](z) + A[-1](x) + b[-1]
    # The N=1 matmul is a VPU multiply + XLU lane reduction; the (tb, 1) output
    # block writes only 4 useful bytes per sample back to HBM.
    zw = jnp.sum(z * w_last_ref[...], axis=-1, keepdims=True)      # (tb, 1) f32
    o = offs[n_hidden]
    out_ref[...] = (zw + ax[:, o:o + 1]).astype(out_ref.dtype)


def icnn_forward_pallas(x, A_weights, A_biases, W_weights, *,
                        block_batch=1024, use_bf16=True):
    """x: (B, input_dim); A_weights[i]: (input_dim, units[i]);
    A_biases[i]: (1, units[i]); W_weights[i]: (units[i], units[i+1]).

    Assumes softplus_W_kernels=False and W already clamped non-negative.
    Returns y of shape (B, 1) in float32.
    """
    B, input_dim = x.shape
    n_layers = len(A_weights)              # == len(hidden_units) + 1
    n_hidden = n_layers - 1
    assert len(W_weights) == n_hidden and len(A_biases) == n_layers

    mm_dtype = jnp.bfloat16 if use_bf16 else jnp.float32

    hidden_dims = [A_weights[i].shape[1] for i in range(n_hidden)]
    hp = [_round_up(d, _LANE) for d in hidden_dims]
    out_pad = _LANE

    # --- fuse the A branch (weights + biases) into one resident matrix ------
    # columns: [A0 | A1 | ... | A_last], each zero-padded to a 128 multiple;
    # rows:    [input_dim weight rows ; bias row ; zero rows up to k_aug].
    k_aug = _round_up(input_dim + 1, _SUBLANE)
    blocks = []
    for i in range(n_hidden):
        w = jnp.pad(A_weights[i], ((0, 0), (0, hp[i] - hidden_dims[i])))
        b = jnp.pad(A_biases[i], ((0, 0), (0, hp[i] - hidden_dims[i])))
        blocks.append(jnp.concatenate([w, b], axis=0))
    w = jnp.pad(A_weights[-1], ((0, 0), (0, out_pad - A_weights[-1].shape[1])))
    b = jnp.pad(A_biases[-1], ((0, 0), (0, out_pad - A_biases[-1].shape[1])))
    blocks.append(jnp.concatenate([w, b], axis=0))
    a_cat = jnp.concatenate(blocks, axis=1)                    # (input_dim+1, Wtot)
    a_cat = jnp.pad(a_cat, ((0, k_aug - (input_dim + 1)), (0, 0))).astype(mm_dtype)

    offs = [0]
    for wd in hp:
        offs.append(offs[-1] + wd)          # offs[n_hidden] = start of final A block

    # --- pad hidden W kernels to lane-dense (hp[i], hp[i+1]) ----------------
    w_pads = []
    for i in range(n_hidden - 1):
        wi = W_weights[i]
        w_pads.append(jnp.pad(wi, ((0, hp[i] - wi.shape[0]),
                                   (0, hp[i + 1] - wi.shape[1]))).astype(mm_dtype))
    w_last = W_weights[-1]                                      # (hidden_dims[-1], 1)
    w_last_row = jnp.pad(w_last.T,
                         ((0, 0), (0, hp[-1] - w_last.shape[0]))).astype(jnp.float32)

    # --- batch tile: big tiles, but keep several grid steps -----------------
    tb = max(_SUBLANE, min(block_batch,
                           _round_up(pl.cdiv(B, _SUBLANE), _SUBLANE),
                           _round_up(B, _SUBLANE)))
    tb = _round_up(tb, _SUBLANE)
    b_pad = _round_up(B, tb)

    x_aug = jnp.concatenate(
        [x.astype(jnp.float32), jnp.ones((B, 1), jnp.float32)], axis=1)
    x_aug = jnp.pad(x_aug, ((0, b_pad - B), (0, k_aug - (input_dim + 1))))
    x_aug = x_aug.astype(mm_dtype)

    grid = (b_pad // tb,)
    args = [x_aug, a_cat, *w_pads, w_last_row]

    def resident(shape):
        return pl.BlockSpec(shape, lambda b: (0, 0))

    in_specs = [pl.BlockSpec((tb, k_aug), lambda b: (b, 0))]      # x tile
    in_specs += [resident(a_cat.shape)]
    in_specs += [resident(w.shape) for w in w_pads]
    in_specs += [resident(w_last_row.shape)]
    out_specs = pl.BlockSpec((tb, 1), lambda b: (b, 0))           # narrow output

    flops = 2 * B * (k_aug * (sum(hp) + out_pad)
                     + sum(hp[i] * hp[i + 1] for i in range(n_hidden - 1))
                     + hp[-1])
    bytes_accessed = sum(int(a.size) * a.dtype.itemsize for a in args) + b_pad * 4
    cost = pl.CostEstimate(flops=int(flops), transcendentals=0,
                           bytes_accessed=int(bytes_accessed))

    # Keep headroom for double-buffered resident weights; cap at v7x's 64 MiB.
    param_bytes = sum(int(a.size) * a.dtype.itemsize for a in args[1:])
    tile_bytes = tb * k_aug * x_aug.dtype.itemsize + tb * 4
    vmem_limit = int(min(64 << 20,
                         max(32 << 20, 2 * param_bytes + 4 * tile_bytes + (4 << 20))))

    kernel = functools.partial(_icnn_kernel, n_hidden, tuple(hp), tuple(offs))

    y_full = pl.pallas_call(
        kernel,
        out_shape=jax.ShapeDtypeStruct((b_pad, 1), jnp.float32),
        grid=grid,
        in_specs=in_specs,
        out_specs=out_specs,
        compiler_params=pltpu.CompilerParams(
            dimension_semantics=("parallel",),
            vmem_limit_bytes=vmem_limit),
        cost_estimate=cost,
    )(*args)
    return y_full[:B]


def icnn_forward_ref(x, A_weights, A_biases, W_weights):
    """Pure-JAX reference mirroring the PyTorch forward (f32, highest precision)."""
    dot = functools.partial(jnp.dot, precision=jax.lax.Precision.HIGHEST,
                            preferred_element_type=jnp.float32)
    z = _leaky_relu(dot(x, A_weights[0]) + A_biases[0])
    z = z * z
    for i in range(len(W_weights) - 1):
        z = _leaky_relu(dot(z, W_weights[i]) + dot(x, A_weights[i + 1]) + A_biases[i + 1])
    return dot(z, W_weights[-1]) + dot(x, A_weights[-1]) + A_biases[-1]


def init_icnn_params(key, input_dim, hidden_units):
    """Deterministic synthetic parameters (shapes match ICNN.__init__)."""
    units = list(hidden_units) + [1]
    A_weights, A_biases, W_weights = [], [], []
    # A: nn.Linear(input_dim, odim, bias=True) for odim in units
    for odim in units:
        key, kw = jax.random.split(key)
        key, kb = jax.random.split(key)
        A_weights.append(0.1 * jax.random.normal(kw, (input_dim, odim), jnp.float32))
        A_biases.append(0.05 * jax.random.normal(kb, (1, odim), jnp.float32))
    # W: nn.Linear(idim, odim, bias=False); non-negative (as after clamp_w()).
    for idim, odim in zip(units[:-1], units[1:]):
        key, k = jax.random.split(key)
        W_weights.append(jnp.abs(0.1 * jax.random.normal(k, (idim, odim), jnp.float32)))
    return A_weights, A_biases, W_weights


if __name__ == "__main__":
    batch = 30                      # not a tile multiple -> exercises batch padding
    input_dim = 16
    hidden_units = [32, 32]

    key = jax.random.PRNGKey(0)
    key, kx = jax.random.split(key)
    x = jax.random.normal(kx, (batch, input_dim), jnp.float32)

    A_weights, A_biases, W_weights = init_icnn_params(key, input_dim, hidden_units)
    y_ref = icnn_forward_ref(x, A_weights, A_biases, W_weights)

    # f32 matmul path: tight bit-fidelity check, small tile so the multi-step
    # pipelined grid path is exercised.
    y32 = icnn_forward_pallas(x, A_weights, A_biases, W_weights,
                              block_batch=8, use_bf16=False)
    y32 = jax.block_until_ready(y32)
    assert y32.shape == (batch, 1)
    assert jnp.allclose(y32, y_ref, atol=1e-4, rtol=1e-4), \
        float(jnp.max(jnp.abs(y32 - y_ref)))

    # bf16 MXU path (production config on v6e/v7x): looser tolerance for bf16
    # operand rounding; elementwise math stays f32.
    ybf = icnn_forward_pallas(x, A_weights, A_biases, W_weights)
    ybf = jax.block_until_ready(ybf)
    assert ybf.shape == (batch, 1)
    assert jnp.allclose(ybf, y_ref, atol=3e-2, rtol=3e-2), \
        float(jnp.max(jnp.abs(ybf - y_ref)))

    # TODO(synk): transport() (grad of y w.r.t. x) is done with jax.grad around
    # this wrapper, not inside the kernel; clamp_w()/penalize_w() are
    # training-time utilities and the softplus_W_kernels=True path is not
    # implemented here.
    print("KERNEL_OK")
</pallas_src>

<mosaic_0001>
module attributes {stable_mosaic.version = 11 : i64} {
  func.func @_icnn_kernel(%arg0: i32, %arg1: memref<8x24xf32, #tpu.memory_space<vmem>>, %arg2: memref<24x384xf32, #tpu.memory_space<vmem>>, %arg3: memref<128x128xf32, #tpu.memory_space<vmem>>, %arg4: memref<1x128xf32, #tpu.memory_space<vmem>>, %arg5: memref<8x1xf32, #tpu.memory_space<vmem>>) attributes {dimension_semantics = [#tpu.dimension_semantics<parallel>], iteration_bounds = array<i64: 4>, scalar_prefetch = 0 : i64, scratch_operands = 0 : i64, tpu.core_type = #tpu.core_type<tc>, window_params = [{transform_indices = @transform_0, window_bounds = array<i64: 8, 24>}, {pipeline_mode = #tpu.pipeline_mode<synchronous>, transform_indices = @transform_1, window_bounds = array<i64: 24, 384>}, {pipeline_mode = #tpu.pipeline_mode<synchronous>, transform_indices = @transform_2, window_bounds = array<i64: 128, 128>}, {pipeline_mode = #tpu.pipeline_mode<synchronous>, transform_indices = @transform_3, window_bounds = array<i64: 1, 128>}, {transform_indices = @transform_4, window_bounds = array<i64: 8, 1>}]} {
    %c0 = arith.constant 0 : index
    %c0_0 = arith.constant 0 : index
    %0 = vector.load %arg1[%c0, %c0_0] : memref<8x24xf32, #tpu.memory_space<vmem>>, vector<8x24xf32>
    %c0_1 = arith.constant 0 : index
    %c0_2 = arith.constant 0 : index
    %1 = vector.load %arg2[%c0_1, %c0_2] : memref<24x384xf32, #tpu.memory_space<vmem>>, vector<24x384xf32>
    %cst = arith.constant dense<0.000000e+00> : vector<8x384xf32>
    %2 = tpu.matmul %0, %1, %cst {dimension_numbers = #tpu.dot_dimension_numbers<[1], [0], [0], [1], [0, 0, 1, 1], [], []>} : vector<8x24xf32>, vector<24x384xf32>, vector<8x384xf32> -> vector<8x384xf32>
    %3 = vector.extract_strided_slice %2 {offsets = [0, 0], sizes = [8, 128], strides = [1, 1]} : vector<8x384xf32> to vector<8x128xf32>
    %cst_3 = arith.constant 0.000000e+00 : f32
    %4 = vector.broadcast %cst_3 : f32 to vector<8x128xf32>
    %5 = arith.cmpf ogt, %3, %4 : vector<8x128xf32>
    %cst_4 = arith.constant 2.000000e-01 : f32
    %6 = vector.broadcast %cst_4 : f32 to vector<8x128xf32>
    %7 = arith.mulf %6, %3 : vector<8x128xf32>
    %8 = arith.select %5, %3, %7 : vector<8x128xi1>, vector<8x128xf32>
    %9 = arith.mulf %8, %8 : vector<8x128xf32>
    %c0_5 = arith.constant 0 : index
    %c0_6 = arith.constant 0 : index
    %10 = vector.load %arg3[%c0_5, %c0_6] : memref<128x128xf32, #tpu.memory_space<vmem>>, vector<128x128xf32>
    %cst_7 = arith.constant dense<0.000000e+00> : vector<8x128xf32>
    %11 = tpu.matmul %9, %10, %cst_7 {dimension_numbers = #tpu.dot_dimension_numbers<[1], [0], [0], [1], [0, 0, 1, 1], [], []>} : vector<8x128xf32>, vector<128x128xf32>, vector<8x128xf32> -> vector<8x128xf32>
    %12 = vector.extract_strided_slice %2 {offsets = [0, 128], sizes = [8, 128], strides = [1, 1]} : vector<8x384xf32> to vector<8x128xf32>
    %13 = arith.addf %11, %12 : vector<8x128xf32>
    %cst_8 = arith.constant 0.000000e+00 : f32
    %14 = vector.broadcast %cst_8 : f32 to vector<8x128xf32>
    %15 = arith.cmpf ogt, %13, %14 : vector<8x128xf32>
    %cst_9 = arith.constant 2.000000e-01 : f32
    %16 = vector.broadcast %cst_9 : f32 to vector<8x128xf32>
    %17 = arith.mulf %16, %13 : vector<8x128xf32>
    %18 = arith.select %15, %13, %17 : vector<8x128xi1>, vector<8x128xf32>
    %c0_10 = arith.constant 0 : index
    %c0_11 = arith.constant 0 : index
    %19 = vector.load %arg4[%c0_10, %c0_11] : memref<1x128xf32, #tpu.memory_space<vmem>>, vector<1x128xf32>
    %20 = vector.broadcast %19 : vector<1x128xf32> to vector<8x128xf32>
    %21 = arith.mulf %18, %20 : vector<8x128xf32>
    %cst_12 = arith.constant dense<0.000000e+00> : vector<8xf32>
    %22 = vector.multi_reduction <add>, %21, %cst_12 [1] : vector<8x128xf32> to vector<8xf32>
    %23 = vector.shape_cast %22 : vector<8xf32> to vector<8x1xf32>
    %24 = vector.extract_strided_slice %2 {offsets = [0, 256], sizes = [8, 1], strides = [1, 1]} : vector<8x384xf32> to vector<8x1xf32>
    %25 = arith.addf %23, %24 : vector<8x1xf32>
    %c0_13 = arith.constant 0 : index
    %c0_14 = arith.constant 0 : index
    %26 = vector.load %arg5[%c0_13, %c0_14] : memref<8x1xf32, #tpu.memory_space<vmem>>, vector<8x1xf32>
    tpu.vector_store %arg5[%c0_13, %c0_14], %25 {strides = array<i32>} : memref<8x1xf32, #tpu.memory_space<vmem>>, vector<8x1xf32>,
    return
  }
  func.func @transform_0(%arg0: i32) -> (i32, i32) {
    %c0_i32 = arith.constant 0 : i32
    %c0_i32_0 = arith.constant 0 : i32
    return %arg0, %c0_i32 : i32, i32
  }
  func.func @transform_1(%arg0: i32) -> (i32, i32) {
    %c0_i32 = arith.constant 0 : i32
    %c0_i32_0 = arith.constant 0 : i32
    %c0_i32_1 = arith.constant 0 : i32
    return %c0_i32, %c0_i32_0 : i32, i32
  }
  func.func @transform_2(%arg0: i32) -> (i32, i32) {
    %c0_i32 = arith.constant 0 : i32
    %c0_i32_0 = arith.constant 0 : i32
    %c0_i32_1 = arith.constant 0 : i32
    return %c0_i32, %c0_i32_0 : i32, i32
  }
  func.func @transform_3(%arg0: i32) -> (i32, i32) {
    %c0_i32 = arith.constant 0 : i32
    %c0_i32_0 = arith.constant 0 : i32
    %c0_i32_1 = arith.constant 0 : i32
    return %c0_i32, %c0_i32_0 : i32, i32
  }
  func.func @transform_4(%arg0: i32) -> (i32, i32) {
    %c0_i32 = arith.constant 0 : i32
    %c0_i32_0 = arith.constant 0 : i32
    return %arg0, %c0_i32 : i32, i32
  }
}

</mosaic_0001>

<bundles_post_ra>
// kernel: tpu_custom_call.1
= control target key start
LH: loop header
LB: loop body
LE: loop exit
PB: predicated region body
PF: predicated region fallthrough
CT: control target
= control target key end

     0   :  { %9 = vsyncpa [#allocation3], 0  ;;  %s922_s0 = inlined_call_operand.vmem [shape: f32[32,24], index: 0, kind: input, shape index: {}]   ;;  %s923_s1 = inlined_call_operand.hbm [shape: f32[24,384], index: 1, kind: input, shape index: {}]   ;;  %s924_s2 = inlined_call_operand.hbm [shape: f32[128,128], index: 2, kind: input, shape index: {}]   ;;  %s925_s3 = inlined_call_operand.vmem [shape: f32[1,128], index: 3, kind: input, shape index: {}]   ;;  %s926_s4 = inlined_call_operand.vmem [shape: f32[32,1], index: 4, kind: output, shape index: {}]  }
   0x1   :  { %10 = vsyncpa [#allocation5], 0  ;;  %s813_s15 = smov 0  }
   0x2 LB: > { %s779_s16 = smov [#allocation2]   ;;  %s819_s18 = sadd.s32 4294967295, %s777_s15   ;;  %s777_s15 = sphi %s813_s15, %s16_s15  }
   0x3   : > { %s148_s17 = sshll.u32 %s779_s16, 4  ;;  %p561_p0 = scmp.ge.s32.totalorder %s777_s15, 1  ;;  %s149_s17 = int_to_ptr.vmem [resolvable:$true] %s148_s17 }
   0x4   : > { %p136_p1 = scmp.lt.s32.totalorder %s777_s15, 5  ;;  %p927_p3 = scmp.eq.s32.totalorder %s819_s18, 0 }
   0x5   : > { %s780_s20 = smov [#allocation4]   ;;  %s707_s25 = scalar_lea.hbm %s923_s1, 1152 }
   0x6   : > { %p823_p2 = pnand %p561_p0, %p136_p1  ;;  %s161_s21 = sshll.u32 %s780_s20, 4  ;;  %s836_s21 = int_to_ptr.vmem [resolvable:$true] %s161_s21 }
   0x7   : > { %p708_p6 = scmp.ne.s32.totalorder %s923_s1, %s707_s25  ;;  %p714_p10 = scmp.lt.u32.totalorder %s707_s25, %s923_s1 }
   0x8   : > { %s929_s19 = scalar_select %p823_p2, 1, 0 }
   0x9   : > { %p679_p4 = pneg %p823_p2 }
   0xb   : > { %p832_p5 = pnand %p927_p3, %p679_p4 }
   0xd   : > { %p709_p7 = pneg %p832_p5 }
   0xf   : > { %p710_p8 = pnand %p709_p7, %p708_p6 }
  0x11   : > { %p711_p9 = pneg %p710_p8 }
  0x13   : > { %p716_p11 = pnand %p714_p10, %p711_p9 }
  0x15   : > { %719 = shalt.err (!%p716_p11)
}
  0x16   : > { %s720_s30 = scalar_lea.vmem %s149_s17, 1152  ;;  %p728_p1 = scmp.lt.s32.totalorder %s149_s17, %s149_s17 }
  0x17   : > { %p721_p12 = scmp.ne.s32.totalorder %s149_s17, %s720_s30  ;;  %p729_p4 = scmp.lt.s32.totalorder %s720_s30, %s720_s30 }
  0x19   : > { %p723_p13 = pnand %p721_p12, %p709_p7  ;;  %p730_p3 = por %p729_p4, %p728_p1 }
  0x1b   : > { %p724_p0 = pneg %p723_p13 }
  0x1d   : > { %p731_p2 = pnand %p730_p3, %p724_p0 }
  0x1f   : > { %734 = shalt.err (!%p731_p2)
}
  0x20   : > { %s781_s5 = smov 384   ;;  %s782_s6 = smov 24  }
  0x21   : > { %682 = dma.hbm_to_vmem [thread:$0]  (!%p832_p5), %s923_s1, 1152, %s149_s17, [#allocation3], %s781_s5, %s781_s5, %s782_s6  }
  0x22   : > { %s735_s11 = scalar_lea.hbm %s924_s2, 2048 }
  0x23   : > { %p736_p6 = scmp.ne.s32.totalorder %s924_s2, %s735_s11  ;;  %p742_p8 = scmp.lt.u32.totalorder %s735_s11, %s924_s2 }
  0x25   : > { %p738_p2 = pnand %p736_p6, %p709_p7 }
  0x27   : > { %p739_p3 = pneg %p738_p2 }
  0x29   : > { %p744_p9 = pnand %p742_p8, %p739_p3 }
  0x2b   : > { %747 = shalt.err (!%p744_p9)
}
  0x2c   : > { %s748_s17 = scalar_lea.vmem %s836_s21, 2048  ;;  %p756_p13 = scmp.lt.s32.totalorder %s836_s21, %s836_s21 }
  0x2d   : > { %p749_p10 = scmp.ne.s32.totalorder %s836_s21, %s748_s17  ;;  %p757_p0 = scmp.lt.s32.totalorder %s748_s17, %s748_s17 }
  0x2f   : > { %p751_p11 = pnand %p749_p10, %p709_p7  ;;  %p758_p1 = por %p757_p0, %p756_p13 }
  0x31   : > { %p752_p12 = pneg %p751_p11 }
  0x33   : > { %p759_p4 = pnand %p758_p1, %p752_p12 }
  0x35   : > { %762 = shalt.err (!%p759_p4)
}
  0x36   : > { %s783_s20 = smov 128   ;;  %s784_s23 = smov 8  }
  0x37   : > { %685 = dma.hbm_to_vmem [thread:$0]  (!%p832_p5), %s924_s2, 2048, %s836_s21, [#allocation5], %s783_s20, %s783_s20, %s784_s23  }
  0x38   : > { %p931_p6 = scmp.ne.s32.totalorder %s929_s19, 0 }
  0x39   : > { %p932_p7 = scmp.eq.s32.totalorder (!%p931_p6), %s819_s18, 0 }
  0x3a   : > { %187 = sbr.rel (%p931_p6) target bundleno = 661 (0x295), region = 36 }
  0x41   : > { %768 = dma.done.wait (%p932_p7), [#allocation3], 1152   ;;  %p933_p2 = pmov %p932_p7 }
  0x43   : > { %770 = vsyncadd (%p933_p2), [#allocation3], 4294966144  ;;  %p934_p3 = pmov %p933_p2 }
  0x44   : > { %p935_p8 = pmov %p933_p2 }
  0x45   : > { %772 = dma.done.wait (%p934_p3), [#allocation5], 2048  }
  0x46   : > { %774 = vsyncadd (%p935_p8), [#allocation5], 4294965248  ;;  %p215_p9 = scmp.lt.s32.totalorder %s819_s18, 3  ;;  %v785_v0 = vmov 0.0   ;;  %v786_v1 = vmov 0.0|0.0   ;;  %v225_v2 = vld [vmem:[#allocation2 + $0x8] sm:$0xff] }
  0x47   : > { %301 = vmatprep.mubr.f32.mxu1 %v785_v0  ;;  %647 = vmatprep.subr.bf16.mxu0 %v786_v1  ;;  %v228_v3 = vld [vmem:[#allocation2 + $0x20] sm:$0xff]  ;;  %v227_v6 = vld [vmem:[#allocation2 + $0x18] sm:$0xff]  ;;  %v382_v9 = vld [vmem:[#allocation4] sm:$0xff]  ;;  %vm233_vm0 = vcmask 195584   ;;  %vm787_vm1 = vmmov 0   ;;  %vm482_vm4 = vcmask 7168  }
  0x48   : > { %s937_s18 = smov (!%p215_p9, %s819_s18), 3  ;;  %v224_v4 = vld [vmem:[#allocation2] sm:$0xff]  ;;  %v640_v5 = vpack.c.bf16 %v228_v3, %v225_v2  ;;  %v231_v8 = vld [vmem:[#allocation2 + $0x38] sm:$0xff]  ;;  %v383_v10 = vld [vmem:[#allocation4 + $0x8] sm:$0xff]  ;;  %637 = vmatprep.mubr.msk.f32.mxu0 %vm787_vm1, %v785_v0 }
  0x49   : > { %s568_s19 = sshll.u32 %s937_s18, 3  ;;  %v642_v7 = vpack.c.bf16 %v227_v6, %v224_v4  ;;  %v648_v11 = vpack.c.bf16 %v383_v10, %v382_v9  ;;  %v384_v12 = vld [vmem:[#allocation4 + $0x10] sm:$0xff]  ;;  %v385_v13 = vld [vmem:[#allocation4 + $0x18] sm:$0xff]  ;;  %v230_v14 = vld [vmem:[#allocation2 + $0x30] sm:$0xff] }
  0x4a   : > { %641 = vmatprep.subr.bf16.mxu1 %v640_v5  ;;  %s218_s26 = scalar_lea.vmem %s922_s0, %s568_s19  ;;  %v651_v15 = vpack.c.bf16 %v385_v13, %v384_v12  ;;  %v386_v17 = vld [vmem:[#allocation4 + $0x20] sm:$0xff]  ;;  %v387_v18 = vld [vmem:[#allocation4 + $0x28] sm:$0xff]  ;;  %v388_v20 = vld [vmem:[#allocation4 + $0x30] sm:$0xff]  ;;  %s222_s5 = scalar_lea.vmem %s926_s4, %s568_s19 }
  0x4b   : > { %643 = vmatpush1.bf16.msra.mxu1 %v642_v7  ;;  %649 = vmatpush3.bf16.msra.mxu0 %v648_v11  ;;  %v223_v16 = vld [vmem:[%s218_s26] sm:$0xff]  ;;  %v654_v19 = vpack.c.bf16 %v387_v18, %v386_v17  ;;  %v390_v23 = vld [vmem:[#allocation4 + $0x40] sm:$0xff]  ;;  %v391_v24 = vld [vmem:[#allocation4 + $0x48] sm:$0xff] }
  0x4c   : > { %241 = vmatprep.subr.mxu1 %v231_v8  ;;  %650 = vmatprep.subr.bf16.mxu0 %v786_v1  ;;  %v389_v21 = vld [vmem:[#allocation4 + $0x38] sm:$0xff]  ;;  %v660_v25 = vpack.c.bf16 %v391_v24, %v390_v23  ;;  %v392_v26 = vld [vmem:[#allocation4 + $0x50] sm:$0xff]  ;;  %v394_v29 = vld [vmem:[#allocation4 + $0x60] sm:$0xff] }
  0x4d   : > { %v657_v22 = vpack.c.bf16 %v389_v21, %v388_v20  ;;  %v393_v27 = vld [vmem:[#allocation4 + $0x58] sm:$0xff]  ;;  %v395_v30 = vld [vmem:[#allocation4 + $0x68] sm:$0xff]  ;;  %v396_v32 = vld [vmem:[#allocation4 + $0x70] sm:$0xff] }
  0x4e   : > { %v663_v28 = vpack.c.bf16 %v393_v27, %v392_v26  ;;  %v666_v31 = vpack.c.bf16 %v395_v30, %v394_v29  ;;  %v397_v33 = vld [vmem:[#allocation4 + $0x78] sm:$0xff]  ;;  %v226_v35 = vld [vmem:[#allocation2 + $0x10] sm:$0xff]  ;;  %v229_v36 = vld [vmem:[#allocation2 + $0x28] sm:$0xff] }
  0x4f   : > { %242 = vmatpush1.msra.mxu1 %v230_v14  ;;  %652 = vmatpush3.bf16.msra.mxu0 %v651_v15  ;;  %v669_v34 = vpack.c.bf16 %v397_v33, %v396_v32  ;;  %v645_v37 = vpack.c.bf16 %v229_v36, %v226_v35  ;;  %v232_v38 = vld [vmem:[#allocation2 + $0x40] sm:$0xff] }
  0x50   : > { %570 = vmatmul.mubr.msk.f32.vlgmr.msra.gmra.mrb[0].mxu1 %vm233_vm0, %v223_v16  ;;  %653 = vmatprep.subr.bf16.mxu0 %v786_v1  ;;  %v572_v50 = vld [vmem:[%s925_s3] ss:$0 sm:$0xff] }
  0x51   : > { %644 = vmatprep.subr.bf16.mxu1 %v786_v1  ;;  %602 = vmatprep.mubr.msk.f32.mxu1 %vm787_vm1, %v785_v0 }
  0x52   : > { %646 = vmatpush3.bf16.msra.mxu1 %v645_v37 }
  0x53   : > { %655 = vmatpush3.bf16.msra.mxu0 %v654_v19  ;;  %600 = vmatprep.subr.mxu1 %v785_v0 }
  0x54   : > { %656 = vmatprep.subr.bf16.mxu0 %v786_v1 }
  0x56   : > { %601 = vmatpush3.msra.mxu1 %v232_v38 }
  0x57   : > { %658 = vmatpush3.bf16.msra.mxu0 %v657_v22  ;;  %603 = vmatmul.mubr.msk.f32.vlgmr.msra.gmra.mrb[2].mxu1 %vm233_vm0, %v223_v16 }
  0x58   : > { %659 = vmatprep.subr.bf16.mxu0 %v786_v1 }
  0x5b   : > { %661 = vmatpush3.bf16.msra.mxu0 %v660_v25 }
  0x5c   : > { %662 = vmatprep.subr.bf16.mxu0 %v786_v1 }
  0x5f   : > { %664 = vmatpush3.bf16.msra.mxu0 %v663_v28 }
  0x60   : > { %665 = vmatprep.subr.bf16.mxu0 %v786_v1 }
  0x63   : > { %667 = vmatpush3.bf16.msra.mxu0 %v666_v31 }
  0x64   : > { %668 = vmatprep.subr.bf16.mxu0 %v786_v1 }
  0x67   : > { %670 = vmatpush3.bf16.msra.mxu0 %v669_v34 }
 0x123   : > { %v303_v39 = vpop.f32.mrb[0].mxu1 }
 0x124   : > { %vm378_vm2 = vcmp.gt.f32.partialorder %v303_v39, 0.0  ;;  %v379_v40 = vmul.f32 0.2, %v303_v39  ;;  %v305_v41 = vpop.f32.mrb[1].mxu1 }
 0x126   : > { %v380_v42 = vsel %vm378_vm2, %v303_v39, %v379_v40 }
 0x127   : > { %v381_v43 = vmul.f32 %v380_v42, %v380_v42 }
 0x129   : > { %638 = vmatmul.mubr.f32.vlgmr.msra.gmra.mrb[0].mxu0 %v381_v43 }
 0x12a   : > { %v374_v44 = vpop.f32.mrb[2].mxu1 }
 0x12b   : > { %v604_v45 = vpop.f32.mrb[3].mxu1 }
 0x1fc   : > { %v464_v46 = vpop.f32.mrb[0].mxu0 }
 0x1fd   : > { %v465_v47 = vadd.f32 %v464_v46, %v305_v41  ;;  %v639_v48 = vpop.f32.mrb[1].mxu0 }
 0x1ff   : > { %v469_v49 = vmul.f32 0.2, %v465_v47  ;;  %vm468_vm3 = vcmp.gt.f32.partialorder %v465_v47, 0.0 }
 0x201   : > { %v470_v51 = vsel %vm468_vm3, %v465_v47, %v469_v49 }
 0x202   : > { %v478_v52 = vmul.f32 %v572_v50, %v470_v51 }
 0x204   : > { %479 = vadd.xlane.f32.xlu0 %v478_v52 }
 0x291   : > { %v480_v53 = vpop.xlane.xlu0 %479 }
 0x292   : > { %v481_v54 = vadd.f32 %v480_v53, %v374_v44 }
 0x294   : > { %483 = vst.msk [vmem:[%s222_s5] sm:$0xff] %vm482_vm4, %v481_v54 }
 0x295 PF: > { %s16_s15 = sadd.s32 1, %s777_s15  }
 0x296   : > { %p13_p5 = scmp.ge.s32.totalorder %s16_s15, 6  }
 0x298   :  { %15 = sbr.rel (!%p13_p5) target bundleno = 2 (0x2), region = 75 }
 0x29f   :  { %503 = vsyncpa [#allocation3], 1 }
 0x2a0   :  { %505 = vsyncpa [#allocation3 + $0x1], 1 }
 0x2a1   :  { %506 = vsyncpa [#allocation5], 1 }

</bundles_post_ra>
